<compile_context>
chip_gen: v5e
topology: v5e:2x2
jax: 0.10.0
libtpu: 0.0.40
codegen_flags: <defaults>
</compile_context>

<pallas_src>
import functools

import jax
import jax.numpy as jnp
import numpy as np
from jax.experimental import pallas as pl
from jax.experimental.pallas import tpu as pltpu


def _round_up(a, b):
    return ((a + b - 1) // b) * b


def _pick_chunk(tb, kdim):
    # Largest row-chunk (multiple of 8, dividing tb) keeping the (chunk, kdim)
    # bf16 one-hot staging <= ~64 KiB so it stays in vregs instead of spilling.
    for c in (256, 128, 64, 32, 16, 8):
        if tb % c == 0 and c * kdim * 2 <= (64 << 10):
            return c
    return 8


def _emb_kernel(num_fields, vpad, chunk, idx_ref, thi_ref, tmid_ref, tlo_ref, out_ref):
    """One grid step: embed `tb` batch rows.

    idx_ref:  VMEM (tb, F)            int32  flat indices (x + offsets, precomputed)
    t*_ref:   VMEM (F*vpad, out_pad)  bf16   block-diagonal table, hi/mid/lo split
    out_ref:  VMEM (tb, out_pad)      f32    lane-dense rows (out_pad % 128 == 0)
    """
    tb = out_ref.shape[0]
    kdim = num_fields * vpad
    n_chunks = tb // chunk

    def compute_chunk(r0):
        idx_c = idx_ref[pl.ds(r0, chunk), :]                       # (chunk, F) int32
        # Block-structured one-hot: a 1 at column f*vpad + idx[:, f] per field.
        # Regenerated per chunk (cheap VPU iota/compares) to bound vreg pressure.
        col = jax.lax.broadcasted_iota(jnp.int32, (chunk, kdim), 1)
        hit = col == idx_c[:, 0:1]
        for f in range(1, num_fields):
            hit = hit | (col == (idx_c[:, f:f + 1] + f * vpad))
        onehot = hit.astype(jnp.bfloat16)                          # exact 0/1 in bf16
        # One block-diagonal matmul per pass -> (chunk, F*D) comes out of the MXU
        # already lane-dense.  Three default-precision bf16 passes against the
        # hi/mid/lo split recover f32 accuracy (~2^-24 rel) without the 6-pass
        # HIGHEST lowering; out-of-range indices hit zero-padded rows -> zeros.
        acc = jnp.dot(onehot, thi_ref[...], preferred_element_type=jnp.float32)
        acc = acc + jnp.dot(onehot, tmid_ref[...], preferred_element_type=jnp.float32)
        acc = acc + jnp.dot(onehot, tlo_ref[...], preferred_element_type=jnp.float32)
        # Single full-width, UNMASKED store per chunk (out_pad is a lane multiple).
        out_ref[pl.ds(r0, chunk), :] = acc.astype(out_ref.dtype)

    if n_chunks <= 8:
        for j in range(n_chunks):                     # short: static unroll
            compute_chunk(j * chunk)
    else:
        def body(j, carry):
            compute_chunk(pl.multiple_of(j * chunk, chunk))
            return carry
        jax.lax.fori_loop(0, n_chunks, body, None, unroll=2)


def emb_forward(x, table, offsets, *, tile_batch=2048, transpose_output=True):
    """x: (batch, num_fields) int; table: (vocab, embed_dim) f32; offsets: (num_fields,) int.

    transpose_output=True  -> (batch, embed_dim, num_fields)  [PyTorch parity]
    transpose_output=False -> (batch, num_fields, embed_dim)  [lane-dense layout,
                              no extra HBM round-trip; prefer when fusing a consumer]
    """
    batch, num_fields = x.shape
    vocab, embed_dim = table.shape

    # Flat indices precomputed outside the kernel (plain vector data, no SMEM).
    idx = x.astype(jnp.int32) + offsets.astype(jnp.int32)[None, :]       # (B, F)

    # ----- table prep (one-time) --------------------------------------------
    vpad = _round_up(vocab, 128)             # per-field block height, lane aligned
    out_width = num_fields * embed_dim
    out_pad = _round_up(out_width, 128)      # lane-dense output -> unmasked stores
    kdim = num_fields * vpad

    table_p = jnp.pad(table, ((0, vpad - vocab), (0, 0)))                # (vpad, D) f32

    # Exact-enough 3-way bf16 split: hi + mid + lo == table to ~2^-24 relative.
    # (A 2-way split would only reach ~2^-17 and fail a 1e-6 check.)
    t_hi = table_p.astype(jnp.bfloat16)
    r = table_p - t_hi.astype(jnp.float32)
    t_mid = r.astype(jnp.bfloat16)
    r = r - t_mid.astype(jnp.float32)
    t_lo = r.astype(jnp.bfloat16)

    def block_diag(t):
        # (F*vpad, out_pad): field f's table copy sits at rows [f*vpad, (f+1)*vpad)
        # and columns [f*D, (f+1)*D).  The zero blocks are free while the MXU has
        # slack and let a single dot emit the lane-dense (chunk, F*D) slab.
        bd = jnp.zeros((kdim, out_pad), dtype=jnp.bfloat16)
        for f in range(num_fields):
            bd = bd.at[f * vpad:(f + 1) * vpad,
                       f * embed_dim:(f + 1) * embed_dim].set(t)
        return bd

    tab_hi, tab_mid, tab_lo = block_diag(t_hi), block_diag(t_mid), block_diag(t_lo)
    # TODO(synk): for large vocab / many fields (block-diag table no longer cheaply
    # VMEM-resident, esp. on v7x's 64 MiB) switch to an HBM table
    # (memory_space=pl.ANY) with index-driven row DMAs instead of the one-hot matmul.

    # ----- batch tiling -------------------------------------------------------
    tb_cap = _round_up(batch, 8)
    tb = min(_round_up(max(int(tile_batch), 8), 8), tb_cap)
    if tb >= tb_cap and batch > 8:
        tb = max(8, _round_up(tb_cap // 2, 8))   # keep >=2 grid steps (v7x megacore)
    b_pad = _round_up(batch, tb)
    if b_pad != batch:
        idx = jnp.pad(idx, ((0, b_pad - batch), (0, 0)))   # padded rows -> index 0 (valid)
    chunk = _pick_chunk(tb, kdim)

    # ----- VMEM budget --------------------------------------------------------
    lane = 128
    vmem_need = (
        2 * tb * lane * 4              # idx blocks (lane-padded to 128), double-buffered
        + 2 * tb * out_pad * 4         # output blocks, double-buffered
        + 2 * 3 * kdim * out_pad * 2   # bf16 tables (constant block; budget 2 buffers each)
        + 2 * chunk * kdim * 2         # one-hot staging slack
        + (4 << 20)                    # compiler scratch margin
    )
    try:
        cap = int(pltpu.get_tpu_info().vmem_capacity_bytes)
    except Exception:
        cap = 64 << 20                 # v7x per-core VMEM, smallest of the fleet
    vmem_limit = int(min(max(vmem_need, 32 << 20), cap - (8 << 20)))

    tab_spec = pl.BlockSpec((kdim, out_pad), lambda i: (0, 0))   # resident, never refetched
    # TODO(synk): single-buffer the resident tables (pipeline_mode=pl.Buffered(1) or an
    # unblocked VMEM-resident spec) to halve their footprint once that path is relied on.

    out = pl.pallas_call(
        functools.partial(_emb_kernel, num_fields, vpad, chunk),
        out_shape=jax.ShapeDtypeStruct((b_pad, out_pad), table.dtype),
        grid_spec=pltpu.PrefetchScalarGridSpec(
            num_scalar_prefetch=0,
            grid=(b_pad // tb,),
            in_specs=[
                pl.BlockSpec((tb, num_fields), lambda i: (i, 0)),   # indices
                tab_spec, tab_spec, tab_spec,                        # hi/mid/lo tables
            ],
            out_specs=pl.BlockSpec((tb, out_pad), lambda i: (i, 0)),
        ),
        compiler_params=pltpu.CompilerParams(
            dimension_semantics=("parallel",),   # batch tiles independent (2 TCs on v7x)
            vmem_limit_bytes=vmem_limit,
        ),
    )(idx, tab_hi, tab_mid, tab_lo)

    out = out[:batch, :out_width].reshape(batch, num_fields, embed_dim)   # free reshape
    if transpose_output:
        # PyTorch: self.embedding(x).transpose(1, 2) -> (B, D, F).  This is the only
        # op that re-touches the output in HBM; fused consumers should take the
        # lane-dense (B, F, D) layout via transpose_output=False instead.
        return jnp.transpose(out, (0, 2, 1))
    return out


def make_params(field_dims, embed_dim, key):
    """Deterministic xavier_uniform init of the embedding table + offsets."""
    vocab = int(sum(field_dims))
    bound = float(np.sqrt(6.0 / (vocab + embed_dim)))
    table = jax.random.uniform(
        key, (vocab, embed_dim), dtype=jnp.float32, minval=-bound, maxval=bound
    )
    offsets = jnp.asarray(
        np.array((0, *np.cumsum(field_dims)[:-1]), dtype=np.int32)
    )
    return table, offsets


if __name__ == "__main__":
    field_dims = (10, 12, 8, 6)   # num_fields = 4, vocab = 36
    embed_dim = 32
    batch = 2
    num_fields = len(field_dims)

    key = jax.random.PRNGKey(0)
    k_tab, k_x = jax.random.split(key)

    table, offsets = make_params(field_dims, embed_dim, k_tab)

    # x[:, f] must be a valid index into field f's vocab slice
    maxvals = jnp.asarray(np.array(field_dims, dtype=np.int32))
    x = jax.random.randint(
        k_x, (batch, num_fields), minval=0, maxval=1_000_000, dtype=jnp.int32
    ) % maxvals[None, :]

    y = emb_forward(x, table, offsets)
    y = jax.block_until_ready(y)

    # reference in plain JAX (same semantics as the PyTorch module)
    ref = jnp.take(table, x + offsets[None, :], axis=0)        # (B, F, D)
    ref = jnp.transpose(ref, (0, 2, 1))                        # (B, D, F)
    assert y.shape == (batch, embed_dim, num_fields), y.shape
    np.testing.assert_allclose(np.asarray(y), np.asarray(ref), rtol=1e-6, atol=1e-6)

    print("KERNEL_OK")
</pallas_src>

<mosaic_0001>
module attributes {stable_mosaic.version = 11 : i64} {
  func.func @_emb_kernel(%arg0: i32, %arg1: memref<8x4xi32, #tpu.memory_space<vmem>>, %arg2: memref<512x128xbf16, #tpu.memory_space<vmem>>, %arg3: memref<512x128xbf16, #tpu.memory_space<vmem>>, %arg4: memref<512x128xbf16, #tpu.memory_space<vmem>>, %arg5: memref<8x128xf32, #tpu.memory_space<vmem>>) attributes {dimension_semantics = [#tpu.dimension_semantics<parallel>], iteration_bounds = array<i64: 1>, scalar_prefetch = 0 : i64, scratch_operands = 0 : i64, tpu.core_type = #tpu.core_type<tc>, window_params = [{transform_indices = @transform_0, window_bounds = array<i64: 8, 4>}, {pipeline_mode = #tpu.pipeline_mode<synchronous>, transform_indices = @transform_1, window_bounds = array<i64: 512, 128>}, {pipeline_mode = #tpu.pipeline_mode<synchronous>, transform_indices = @transform_2, window_bounds = array<i64: 512, 128>}, {pipeline_mode = #tpu.pipeline_mode<synchronous>, transform_indices = @transform_3, window_bounds = array<i64: 512, 128>}, {transform_indices = @transform_4, window_bounds = array<i64: 8, 128>}]} {
    %c0 = arith.constant 0 : index
    %c0_0 = arith.constant 0 : index
    %0 = vector.load %arg1[%c0, %c0_0] : memref<8x4xi32, #tpu.memory_space<vmem>>, vector<8x4xi32>
    %1 = tpu.iota {dimensions = array<i32: 1>} : vector<8x512xi32>
    %2 = vector.extract_strided_slice %0 {offsets = [0, 0], sizes = [8, 1], strides = [1, 1]} : vector<8x4xi32> to vector<8x1xi32>
    %3 = vector.broadcast %2 : vector<8x1xi32> to vector<8x512xi32>
    %4 = arith.cmpi eq, %1, %3 : vector<8x512xi32>
    %5 = vector.extract_strided_slice %0 {offsets = [0, 1], sizes = [8, 1], strides = [1, 1]} : vector<8x4xi32> to vector<8x1xi32>
    %c128_i32 = arith.constant 128 : i32
    %6 = vector.broadcast %c128_i32 : i32 to vector<8x1xi32>
    %7 = arith.addi %5, %6 : vector<8x1xi32>
    %8 = vector.broadcast %7 : vector<8x1xi32> to vector<8x512xi32>
    %9 = arith.cmpi eq, %1, %8 : vector<8x512xi32>
    %10 = arith.ori %4, %9 : vector<8x512xi1>
    %11 = vector.extract_strided_slice %0 {offsets = [0, 2], sizes = [8, 1], strides = [1, 1]} : vector<8x4xi32> to vector<8x1xi32>
    %c256_i32 = arith.constant 256 : i32
    %12 = vector.broadcast %c256_i32 : i32 to vector<8x1xi32>
    %13 = arith.addi %11, %12 : vector<8x1xi32>
    %14 = vector.broadcast %13 : vector<8x1xi32> to vector<8x512xi32>
    %15 = arith.cmpi eq, %1, %14 : vector<8x512xi32>
    %16 = arith.ori %10, %15 : vector<8x512xi1>
    %17 = vector.extract_strided_slice %0 {offsets = [0, 3], sizes = [8, 1], strides = [1, 1]} : vector<8x4xi32> to vector<8x1xi32>
    %c384_i32 = arith.constant 384 : i32
    %18 = vector.broadcast %c384_i32 : i32 to vector<8x1xi32>
    %19 = arith.addi %17, %18 : vector<8x1xi32>
    %20 = vector.broadcast %19 : vector<8x1xi32> to vector<8x512xi32>
    %21 = arith.cmpi eq, %1, %20 : vector<8x512xi32>
    %22 = arith.ori %16, %21 : vector<8x512xi1>
    %23 = arith.extui %22 : vector<8x512xi1> to vector<8x512xi32>
    %24 = arith.sitofp %23 : vector<8x512xi32> to vector<8x512xf32>
    %25 = arith.truncf %24 : vector<8x512xf32> to vector<8x512xbf16>
    %c0_1 = arith.constant 0 : index
    %c0_2 = arith.constant 0 : index
    %26 = vector.load %arg2[%c0_1, %c0_2] : memref<512x128xbf16, #tpu.memory_space<vmem>>, vector<512x128xbf16>
    %cst = arith.constant dense<0.000000e+00> : vector<8x128xf32>
    %27 = tpu.matmul %25, %26, %cst {dimension_numbers = #tpu.dot_dimension_numbers<[1], [0], [0], [1], [0, 0, 1, 1], [], []>} : vector<8x512xbf16>, vector<512x128xbf16>, vector<8x128xf32> -> vector<8x128xf32>
    %c0_3 = arith.constant 0 : index
    %c0_4 = arith.constant 0 : index
    %28 = vector.load %arg3[%c0_3, %c0_4] : memref<512x128xbf16, #tpu.memory_space<vmem>>, vector<512x128xbf16>
    %cst_5 = arith.constant dense<0.000000e+00> : vector<8x128xf32>
    %29 = tpu.matmul %25, %28, %cst_5 {dimension_numbers = #tpu.dot_dimension_numbers<[1], [0], [0], [1], [0, 0, 1, 1], [], []>} : vector<8x512xbf16>, vector<512x128xbf16>, vector<8x128xf32> -> vector<8x128xf32>
    %30 = arith.addf %27, %29 : vector<8x128xf32>
    %c0_6 = arith.constant 0 : index
    %c0_7 = arith.constant 0 : index
    %31 = vector.load %arg4[%c0_6, %c0_7] : memref<512x128xbf16, #tpu.memory_space<vmem>>, vector<512x128xbf16>
    %cst_8 = arith.constant dense<0.000000e+00> : vector<8x128xf32>
    %32 = tpu.matmul %25, %31, %cst_8 {dimension_numbers = #tpu.dot_dimension_numbers<[1], [0], [0], [1], [0, 0, 1, 1], [], []>} : vector<8x512xbf16>, vector<512x128xbf16>, vector<8x128xf32> -> vector<8x128xf32>
    %33 = arith.addf %30, %32 : vector<8x128xf32>
    %c0_9 = arith.constant 0 : index
    %c0_10 = arith.constant 0 : index
    %34 = vector.load %arg5[%c0_9, %c0_10] : memref<8x128xf32, #tpu.memory_space<vmem>>, vector<8x128xf32>
    tpu.vector_store %arg5[%c0_9, %c0_10], %33 {strides = array<i32>} : memref<8x128xf32, #tpu.memory_space<vmem>>, vector<8x128xf32>,
    return
  }
  func.func @transform_0(%arg0: i32) -> (i32, i32) {
    %c0_i32 = arith.constant 0 : i32
    %c0_i32_0 = arith.constant 0 : i32
    return %arg0, %c0_i32 : i32, i32
  }
  func.func @transform_1(%arg0: i32) -> (i32, i32) {
    %c0_i32 = arith.constant 0 : i32
    %c0_i32_0 = arith.constant 0 : i32
    %c0_i32_1 = arith.constant 0 : i32
    return %c0_i32, %c0_i32_0 : i32, i32
  }
  func.func @transform_2(%arg0: i32) -> (i32, i32) {
    %c0_i32 = arith.constant 0 : i32
    %c0_i32_0 = arith.constant 0 : i32
    %c0_i32_1 = arith.constant 0 : i32
    return %c0_i32, %c0_i32_0 : i32, i32
  }
  func.func @transform_3(%arg0: i32) -> (i32, i32) {
    %c0_i32 = arith.constant 0 : i32
    %c0_i32_0 = arith.constant 0 : i32
    %c0_i32_1 = arith.constant 0 : i32
    return %c0_i32, %c0_i32_0 : i32, i32
  }
  func.func @transform_4(%arg0: i32) -> (i32, i32) {
    %c0_i32 = arith.constant 0 : i32
    %c0_i32_0 = arith.constant 0 : i32
    return %arg0, %c0_i32 : i32, i32
  }
}

</mosaic_0001>

<bundles_post_ra>
// kernel: tpu_custom_call.1
= control target key start
LH: loop header
LB: loop body
LE: loop exit
PB: predicated region body
PF: predicated region fallthrough
CT: control target
= control target key end

     0   :  { %9 = vsyncpa [#allocation3], 0  ;;  %s1799_s0 = inlined_call_operand.vmem [shape: s32[8,4], index: 0, kind: input, shape index: {}]   ;;  %s1800_s1 = inlined_call_operand.hbm [shape: bf16[512,128], index: 1, kind: input, shape index: {}]   ;;  %s1801_s2 = inlined_call_operand.hbm [shape: bf16[512,128], index: 2, kind: input, shape index: {}]   ;;  %s1802_s3 = inlined_call_operand.hbm [shape: bf16[512,128], index: 3, kind: input, shape index: {}]   ;;  %s1803_s4 = inlined_call_operand.hbm [shape: f32[8,128], index: 4, kind: output, shape index: {}]  }
   0x1   :  { %10 = vsyncpa [#allocation6], 0 }
   0x2   :  { %11 = vsyncpa [#allocation4], 0  ;;  %s31_s17 = sshll.u32 %s1801_s2, 4  ;;  %s1696_s18 = smov [#allocation5]   ;;  %s32_s17 = int_to_ptr.hbm [resolvable:$true] %s31_s17 }
   0x3   :  { %s33_s19 = sshll.u32 %s1696_s18, 4  ;;  %s18_s22 = sshll.u32 %s1800_s1, 4  ;;  %s34_s19 = int_to_ptr.vmem [resolvable:$true] %s33_s19  ;;  %s19_s22 = int_to_ptr.hbm [resolvable:$true] %s18_s22 }
   0x4   :  { %s1697_s23 = smov 64   ;;  %s1698_s24 = smov 4  }
   0x5   :  { %39 = dma.hbm_to_vmem [thread:$0]  %s32_s17, 4096, %s34_s19, [#allocation6], %s1697_s23, %s1697_s23, %s1698_s24  }
   0x6   :  { %s1699_s25 = smov [#allocation2]   ;;  %s44_s29 = sshll.u32 %s1802_s3, 4  ;;  %s45_s29 = int_to_ptr.hbm [resolvable:$true] %s44_s29 }
   0x7   :  { %s20_s26 = sshll.u32 %s1699_s25, 4  ;;  %s1700_s2 = smov [#allocation7]   ;;  %s21_s26 = int_to_ptr.vmem [resolvable:$true] %s20_s26 }
   0x8   :  { %26 = dma.hbm_to_vmem [thread:$0]  %s19_s22, 4096, %s21_s26, [#allocation3], %s1697_s23, %s1697_s23, %s1698_s24  }
   0x9   :  { %s46_s30 = sshll.u32 %s1700_s2, 4  ;;  %s47_s30 = int_to_ptr.vmem [resolvable:$true] %s46_s30 }
   0xa   :  { %52 = dma.hbm_to_vmem [thread:$0]  %s45_s29, 4096, %s47_s30, [#allocation6], %s1697_s23, %s1697_s23, %s1698_s24  }
   0xb   :  { %1690 = dma.done.wait [#allocation3], 4096  }
   0xc   :  { %1691 = vsyncadd [#allocation3], 4294963200 }
   0xd   :  { %1692 = dma.done.wait [#allocation6], 8192  }
   0xe   :  { %1693 = vsyncadd [#allocation6], 4294959104  ;;  %v1701_v0 = vmov 0   ;;  %v1702_v1 = vmov 2   ;;  %v65_v2 = vld [vmem:[%s1799_s0] sm:$0xff]  ;;  %v1521_v3 = vld [vmem:[#allocation5 + $0x38] sm:$0xff] }
   0xf   :  { %1589 = vset.pattern.permute.xlu0 %v1701_v0  ;;  %1591 = vset.pattern.permute.xlu1 %v1702_v1  ;;  %v1529_v4 = vld [vmem:[#allocation5 + $0x78] sm:$0xff]  ;;  %v90_v5 = vadd.s32 256, %v65_v2  ;;  %v1520_v8 = vld [vmem:[#allocation5 + $0x30] sm:$0xff]  ;;  %v78_v12 = vadd.s32 128, %v65_v2  ;;  %v1519_v13 = vld [vmem:[#allocation5 + $0x28] sm:$0xff]  ;;  %v102_v15 = vadd.s32 384, %v65_v2 }
  0x10   :  { %72 = vperm.xlu0 %1589, %v65_v2   ;;  %v1537_v6 = vld [vmem:[#allocation5 + $0xb8] sm:$0xff]  ;;  %446 = vmatpush.bf16.msra.mxu0 %v1521_v3  ;;  %v1528_v9 = vld [vmem:[#allocation5 + $0x70] sm:$0xff]  ;;  %v1527_v14 = vld [vmem:[#allocation5 + $0x68] sm:$0xff]  ;;  %v1703_v17 = vmov 1   ;;  %v1704_v20 = vmov 3   ;;  %s1706_s0 = smov [#allocation8]  }
  0x11   :  { %v1545_v7 = vld [vmem:[#allocation5 + $0xf8] sm:$0xff]  ;;  %459 = vmatpush.bf16.msra.mxu1 %v1529_v4  ;;  %92 = vperm.xlu1 %1591, %v90_v5   ;;  %v1536_v10 = vld [vmem:[#allocation5 + $0xb0] sm:$0xff]  ;;  %v1535_v16 = vld [vmem:[#allocation5 + $0xa8] sm:$0xff]  ;;  %s1057_s3 = sshll.u32 %s1706_s0, 4  ;;  %s1059_s8 = sshll.u32 %s1803_s4, 4  ;;  %s1058_s3 = int_to_ptr.vmem [resolvable:$true] %s1057_s3  ;;  %s1060_s8 = int_to_ptr.hbm [resolvable:$true] %s1059_s8 }
  0x12   :  { %472 = vmatpush.bf16.msra.mxu2 %v1537_v6  ;;  %485 = vmatpush.bf16.msra.mxu3 %v1545_v7  ;;  %v1544_v11 = vld [vmem:[#allocation5 + $0xf0] sm:$0xff]  ;;  %v1543_v18 = vld [vmem:[#allocation5 + $0xe8] sm:$0xff]  ;;  %v1518_v19 = vld [vmem:[#allocation5 + $0x20] sm:$0xff] }
  0x13   :  { %v1526_v21 = vld [vmem:[#allocation5 + $0x60] sm:$0xff]  ;;  %v1517_v24 = vld [vmem:[#allocation5 + $0x18] sm:$0xff]  ;;  %v1516_v28 = vld [vmem:[#allocation5 + $0x10] sm:$0xff] }
  0x14   :  { %447 = vmatpush.bf16.msra.mxu0 %v1520_v8  ;;  %v1534_v22 = vld [vmem:[#allocation5 + $0xa0] sm:$0xff]  ;;  %v1525_v25 = vld [vmem:[#allocation5 + $0x58] sm:$0xff]  ;;  %v1524_v29 = vld [vmem:[#allocation5 + $0x50] sm:$0xff] }
  0x15   :  { %460 = vmatpush.bf16.msra.mxu1 %v1528_v9  ;;  %v1542_v23 = vld [vmem:[#allocation5 + $0xe0] sm:$0xff]  ;;  %v1533_v26 = vld [vmem:[#allocation5 + $0x98] sm:$0xff]  ;;  %v1532_v30 = vld [vmem:[#allocation5 + $0x90] sm:$0xff] }
  0x16   :  { %473 = vmatpush.bf16.msra.mxu2 %v1536_v10  ;;  %486 = vmatpush.bf16.msra.mxu3 %v1544_v11  ;;  %v1541_v27 = vld [vmem:[#allocation5 + $0xd8] sm:$0xff]  ;;  %v1540_v31 = vld [vmem:[#allocation5 + $0xd0] sm:$0xff]  ;;  %v1515_v32 = vld [vmem:[#allocation5 + $0x8] sm:$0xff]  ;;  %v66_v10 = vlaneseq }
  0x17   :  { %v1523_v33 = vld [vmem:[#allocation5 + $0x48] sm:$0xff]  ;;  %v1514_v36 = vld [vmem:[#allocation5] sm:$0xff]  ;;  %v1489_v38 = vld [vmem:[#allocation2 + $0x38] sm:$0xff] }
  0x18   :  { %1590 = vset.pattern.permute.xlu0 %v1703_v17  ;;  %448 = vmatpush.bf16.msra.mxu0 %v1519_v13  ;;  %v1531_v34 = vld [vmem:[#allocation5 + $0x88] sm:$0xff]  ;;  %v1522_v37 = vld [vmem:[#allocation5 + $0x40] sm:$0xff]  ;;  %v1497_v40 = vld [vmem:[#allocation2 + $0x78] sm:$0xff]  ;;  %v67_v11 = vand.u32 127, %v66_v10 }
  0x19   :  { %80 = vperm.xlu0 %1590, %v78_v12   ;;  %1592 = vset.pattern.permute.xlu1 %v1704_v20  ;;  %v1539_v35 = vld [vmem:[#allocation5 + $0xc8] sm:$0xff]  ;;  %v1530_v39 = vld [vmem:[#allocation5 + $0x80] sm:$0xff]  ;;  %v1505_v42 = vld [vmem:[#allocation2 + $0xb8] sm:$0xff] }
  0x1a   :  { %461 = vmatpush.bf16.msra.mxu1 %v1527_v14  ;;  %104 = vperm.xlu1 %1592, %v102_v15   ;;  %v1538_v41 = vld [vmem:[#allocation5 + $0xc0] sm:$0xff]  ;;  %v1513_v43 = vld [vmem:[#allocation2 + $0xf8] sm:$0xff]  ;;  %v1488_v44 = vld [vmem:[#allocation2 + $0x30] sm:$0xff]  ;;  %v68_v13 = vadd.s32 128, %v67_v11 }
  0x1b   :  { %474 = vmatpush.bf16.msra.mxu2 %v1535_v16  ;;  %487 = vmatpush.bf16.msra.mxu3 %v1543_v18  ;;  %v1496_v45 = vld [vmem:[#allocation2 + $0x70] sm:$0xff]  ;;  %v1487_v48 = vld [vmem:[#allocation2 + $0x28] sm:$0xff]  ;;  %v1486_v52 = vld [vmem:[#allocation2 + $0x20] sm:$0xff]  ;;  %v69_v16 = vadd.s32 256, %v67_v11  ;;  %v1705_v18 = vmov 1.0|1.0  }
  0x1c   :  { %449 = vmatpush.bf16.msra.mxu0 %v1518_v19  ;;  %v1504_v46 = vld [vmem:[#allocation2 + $0xb0] sm:$0xff]  ;;  %v1495_v49 = vld [vmem:[#allocation2 + $0x68] sm:$0xff]  ;;  %v1494_v53 = vld [vmem:[#allocation2 + $0x60] sm:$0xff] }
  0x1d   :  { %v1512_v47 = vld [vmem:[#allocation2 + $0xf0] sm:$0xff]  ;;  %v1503_v50 = vld [vmem:[#allocation2 + $0xa8] sm:$0xff]  ;;  %v1502_v54 = vld [vmem:[#allocation2 + $0xa0] sm:$0xff] }
  0x1e   :  { %462 = vmatpush.bf16.msra.mxu1 %v1526_v21  ;;  %v1511_v51 = vld [vmem:[#allocation2 + $0xe8] sm:$0xff]  ;;  %v1510_v55 = vld [vmem:[#allocation2 + $0xe0] sm:$0xff]  ;;  %v1485_v56 = vld [vmem:[#allocation2 + $0x18] sm:$0xff]  ;;  %v70_v21 = vadd.s32 384, %v67_v11 }
  0x1f   :  { %475 = vmatpush.bf16.msra.mxu2 %v1534_v22  ;;  %488 = vmatpush.bf16.msra.mxu3 %v1542_v23  ;;  %v1493_v57 = vld [vmem:[#allocation2 + $0x58] sm:$0xff]  ;;  %v1484_v60 = vld [vmem:[#allocation2 + $0x10] sm:$0xff]  ;;  %v1483_v0 = vld [vmem:[#allocation2 + $0x8] sm:$0xff] }
  0x20   :  { %450 = vmatpush.bf16.msra.mxu0 %v1517_v24  ;;  %v1501_v58 = vld [vmem:[#allocation2 + $0x98] sm:$0xff]  ;;  %v1492_v61 = vld [vmem:[#allocation2 + $0x50] sm:$0xff]  ;;  %v1491_v1 = vld [vmem:[#allocation2 + $0x48] sm:$0xff] }
  0x21   :  { %1593 = vset.pattern.permute.xlu0 %v1704_v20  ;;  %v1509_v59 = vld [vmem:[#allocation2 + $0xd8] sm:$0xff]  ;;  %v1500_v62 = vld [vmem:[#allocation2 + $0x90] sm:$0xff]  ;;  %v1499_v2 = vld [vmem:[#allocation2 + $0x88] sm:$0xff] }
  0x22   :  { %463 = vmatpush.bf16.msra.mxu1 %v1525_v25  ;;  %v1508_v63 = vld [vmem:[#allocation2 + $0xd0] sm:$0xff]  ;;  %v1507_v3 = vld [vmem:[#allocation2 + $0xc8] sm:$0xff]  ;;  %v1482_v4 = vld [vmem:[#allocation2] sm:$0xff] }
  0x23   :  { %476 = vmatpush.bf16.msra.mxu2 %v1533_v26  ;;  %489 = vmatpush.bf16.msra.mxu3 %v1541_v27  ;;  %v1490_v5 = vld [vmem:[#allocation2 + $0x40] sm:$0xff]  ;;  %v1553_v15 = vld [vmem:[#allocation7 + $0x38] sm:$0xff]  ;;  %v1552_v20 = vld [vmem:[#allocation7 + $0x30] sm:$0xff] }
  0x24   :  { %451 = vmatpush.bf16.msra.mxu0 %v1516_v28  ;;  %v1498_v6 = vld [vmem:[#allocation2 + $0x80] sm:$0xff]  ;;  %v1561_v19 = vld [vmem:[#allocation7 + $0x78] sm:$0xff]  ;;  %v1560_v24 = vld [vmem:[#allocation7 + $0x70] sm:$0xff] }
  0x25   :  { %v1506_v7 = vld [vmem:[#allocation2 + $0xc0] sm:$0xff]  ;;  %v1569_v23 = vld [vmem:[#allocation7 + $0xb8] sm:$0xff]  ;;  %v1551_v25 = vld [vmem:[#allocation7 + $0x28] sm:$0xff] }
  0x26   :  { %464 = vmatpush.bf16.msra.mxu1 %v1524_v29  ;;  %v1577_v27 = vld [vmem:[#allocation7 + $0xf8] sm:$0xff]  ;;  %v1568_v28 = vld [vmem:[#allocation7 + $0xb0] sm:$0xff]  ;;  %v1559_v29 = vld [vmem:[#allocation7 + $0x68] sm:$0xff] }
  0x27   :  { %477 = vmatpush.bf16.msra.mxu2 %v1532_v30  ;;  %490 = vmatpush.bf16.msra.mxu3 %v1540_v31  ;;  %v1550_v30 = vld [vmem:[#allocation7 + $0x20] sm:$0xff] }
  0x28   :  { %452 = vmatpush.bf16.msra.mxu0 %v1515_v32  ;;  %v1576_v32 = vld [vmem:[#allocation7 + $0xf0] sm:$0xff] }
  0x2a   :  { %465 = vmatpush.bf16.msra.mxu1 %v1523_v33  ;;  %v1567_v33 = vld [vmem:[#allocation7 + $0xa8] sm:$0xff] }
  0x2b   :  { %478 = vmatpush.bf16.msra.mxu2 %v1531_v34  ;;  %491 = vmatpush.bf16.msra.mxu3 %v1539_v35  ;;  %v1558_v34 = vld [vmem:[#allocation7 + $0x60] sm:$0xff]  ;;  %v1549_v35 = vld [vmem:[#allocation7 + $0x18] sm:$0xff] }
  0x2c   :  { %453 = vmatpush.bf16.msra.mxu0 %v1514_v36  ;;  %v1575_v36 = vld [vmem:[#allocation7 + $0xe8] sm:$0xff] }
  0x2e   :  { %466 = vmatpush.bf16.msra.mxu1 %v1522_v37  ;;  %v1566_v37 = vld [vmem:[#allocation7 + $0xa0] sm:$0xff] }
  0x2f   :  { %479 = vmatpush.bf16.msra.mxu2 %v1530_v39  ;;  %492 = vmatpush.bf16.msra.mxu3 %v1538_v41  ;;  %v1548_v39 = vld [vmem:[#allocation7 + $0x10] sm:$0xff]  ;;  %v1565_v41 = vld [vmem:[#allocation7 + $0x98] sm:$0xff] }
  0x30   :  { %690 = vmatpush.bf16.msrb.mxu0 %v1489_v38  ;;  %v1557_v38 = vld [vmem:[#allocation7 + $0x58] sm:$0xff] }
  0x32   :  { %703 = vmatpush.bf16.msrb.mxu1 %v1497_v40  ;;  %v1574_v40 = vld [vmem:[#allocation7 + $0xe0] sm:$0xff] }
  0x33   :  { %716 = vmatpush.bf16.msrb.mxu2 %v1505_v42  ;;  %729 = vmatpush.bf16.msrb.mxu3 %v1513_v43  ;;  %v1556_v42 = vld [vmem:[#allocation7 + $0x50] sm:$0xff]  ;;  %v1547_v43 = vld [vmem:[#allocation7 + $0x8] sm:$0xff] }
  0x34   :  { %691 = vmatpush.bf16.msrb.mxu0 %v1488_v44  ;;  %v1573_v44 = vld [vmem:[#allocation7 + $0xd8] sm:$0xff] }
  0x36   :  { %704 = vmatpush.bf16.msrb.mxu1 %v1496_v45  ;;  %v1564_v45 = vld [vmem:[#allocation7 + $0x90] sm:$0xff] }
  0x37   :  { %717 = vmatpush.bf16.msrb.mxu2 %v1504_v46  ;;  %730 = vmatpush.bf16.msrb.mxu3 %v1512_v47  ;;  %v1555_v46 = vld [vmem:[#allocation7 + $0x48] sm:$0xff]  ;;  %v1546_v47 = vld [vmem:[#allocation7] sm:$0xff] }
  0x38   :  { %692 = vmatpush.bf16.msrb.mxu0 %v1487_v48  ;;  %v1572_v48 = vld [vmem:[#allocation7 + $0xd0] sm:$0xff] }
  0x3a   :  { %705 = vmatpush.bf16.msrb.mxu1 %v1495_v49  ;;  %v1563_v49 = vld [vmem:[#allocation7 + $0x88] sm:$0xff] }
  0x3b   :  { %718 = vmatpush.bf16.msrb.mxu2 %v1503_v50  ;;  %731 = vmatpush.bf16.msrb.mxu3 %v1511_v51  ;;  %v1554_v50 = vld [vmem:[#allocation7 + $0x40] sm:$0xff]  ;;  %v1571_v51 = vld [vmem:[#allocation7 + $0xc8] sm:$0xff] }
  0x3c   :  { %693 = vmatpush.bf16.msrb.mxu0 %v1486_v52  ;;  %v1562_v52 = vld [vmem:[#allocation7 + $0x80] sm:$0xff] }
  0x3e   :  { %706 = vmatpush.bf16.msrb.mxu1 %v1494_v53  ;;  %v1570_v53 = vld [vmem:[#allocation7 + $0xc0] sm:$0xff] }
  0x3f   :  { %719 = vmatpush.bf16.msrb.mxu2 %v1502_v54  ;;  %732 = vmatpush.bf16.msrb.mxu3 %v1510_v55 }
  0x40   :  { %694 = vmatpush.bf16.msrb.mxu0 %v1485_v56 }
  0x42   :  { %707 = vmatpush.bf16.msrb.mxu1 %v1493_v57 }
  0x43   :  { %720 = vmatpush.bf16.msrb.mxu2 %v1501_v58  ;;  %733 = vmatpush.bf16.msrb.mxu3 %v1509_v59 }
  0x44   :  { %695 = vmatpush.bf16.msrb.mxu0 %v1484_v60 }
  0x46   :  { %708 = vmatpush.bf16.msrb.mxu1 %v1492_v61 }
  0x47   :  { %721 = vmatpush.bf16.msrb.mxu2 %v1500_v62  ;;  %734 = vmatpush.bf16.msrb.mxu3 %v1508_v63 }
  0x48   :  { %696 = vmatpush.bf16.msrb.mxu0 %v1483_v0 }
  0x4a   :  { %709 = vmatpush.bf16.msrb.mxu1 %v1491_v1 }
  0x4b   :  { %722 = vmatpush.bf16.msrb.mxu2 %v1499_v2  ;;  %735 = vmatpush.bf16.msrb.mxu3 %v1507_v3 }
  0x4c   :  { %697 = vmatpush.bf16.msrb.mxu0 %v1482_v4 }
  0x4e   :  { %710 = vmatpush.bf16.msrb.mxu1 %v1490_v5 }
  0x4f   :  { %723 = vmatpush.bf16.msrb.mxu2 %v1498_v6  ;;  %736 = vmatpush.bf16.msrb.mxu3 %v1506_v7 }
  0x82   :  { %v73_v8 = vpop.permute.xlu0 %72 }
  0x83   :  { %v93_v9 = vpop.permute.xlu1 %92  ;;  %vm74_vm1 = vcmp.eq.s32.totalorder %v67_v11, %v73_v8  ;;  %vm75_vm9 = vcmp.eq.s32.totalorder %v68_v13, %v73_v8 }
  0x84   :  { %vm94_vm3 = vcmp.eq.s32.totalorder %v67_v11, %v93_v9  ;;  %vm95_vm12 = vcmp.eq.s32.totalorder %v68_v13, %v93_v9 }
  0x8b   :  { %v81_v12 = vpop.permute.xlu0 %80 }
  0x8c   :  { %vm82_vm0 = vcmp.eq.s32.totalorder %v67_v11, %v81_v12  ;;  %v105_v14 = vpop.permute.xlu1 %104  ;;  %vm83_vm4 = vcmp.eq.s32.totalorder %v68_v13, %v81_v12  ;;  %vm84_vm13 = vcmp.eq.s32.totalorder %v69_v16, %v81_v12 }
  0x8d   :  { %vm86_vm2 = vmor %vm74_vm1, %vm82_vm0  ;;  %vm106_vm6 = vcmp.eq.s32.totalorder %v67_v11, %v105_v14  ;;  %vm107_vm10 = vcmp.eq.s32.totalorder %v68_v13, %v105_v14  ;;  %vm76_vm1 = vcmp.eq.s32.totalorder %v69_v16, %v73_v8 }
  0x8e   :  { %vm98_vm5 = vmor %vm86_vm2, %vm94_vm3  ;;  %vm108_vm2 = vcmp.eq.s32.totalorder %v69_v16, %v105_v14 }
  0x8f   :  { %vm110_vm7 = vmor %vm98_vm5, %vm106_vm6  ;;  %vm85_vm5 = vcmp.eq.s32.totalorder %v70_v21, %v81_v12 }
  0x90   :  { %vm1744_vm8 = vmpackc.low %vm110_vm7, %vm110_vm7 }
  0x91   :  { %1203 = vmatmul.msk.bf16.vlgmr.msra.gmra.mxu0 %vm1744_vm8, %v1705_v18  ;;  %vm87_vm11 = vmor %vm75_vm9, %vm83_vm4  ;;  %vm96_vm4 = vcmp.eq.s32.totalorder %v69_v16, %v93_v9 }
  0x92   :  { %vm99_vm14 = vmor %vm87_vm11, %vm95_vm12  ;;  %998 = vmatpush.bf16.msra.mxu0 %v1553_v15  ;;  %vm109_vm11 = vcmp.eq.s32.totalorder %v70_v21, %v105_v14 }
  0x93   :  { %vm111_vm15 = vmor %vm99_vm14, %vm107_vm10  ;;  %vm77_vm10 = vcmp.eq.s32.totalorder %v70_v21, %v73_v8 }
  0x94   :  { %vm1751_vm0 = vmpackc.low %vm111_vm15, %vm111_vm15 }
  0x95   :  { %1205 = vmatmul.msk.bf16.vlgmr.msra.gmra.mxu1 %vm1751_vm0, %v1705_v18  ;;  %vm88_vm3 = vmor %vm76_vm1, %vm84_vm13  ;;  %vm97_vm13 = vcmp.eq.s32.totalorder %v70_v21, %v93_v9 }
  0x96   :  { %vm100_vm6 = vmor %vm88_vm3, %vm96_vm4  ;;  %1011 = vmatpush.bf16.msra.mxu1 %v1561_v19  ;;  %999 = vmatpush.bf16.msra.mxu0 %v1552_v20 }
  0x97   :  { %vm112_vm7 = vmor %vm100_vm6, %vm108_vm2 }
  0x98   :  { %vm1758_vm9 = vmpackc.low %vm112_vm7, %vm112_vm7 }
  0x99   :  { %1207 = vmatmul.msk.bf16.vlgmr.msra.gmra.mxu2 %vm1758_vm9, %v1705_v18  ;;  %vm89_vm12 = vmor %vm77_vm10, %vm85_vm5 }
  0x9a   :  { %vm101_vm14 = vmor %vm89_vm12, %vm97_vm13  ;;  %1024 = vmatpush.bf16.msra.mxu2 %v1569_v23  ;;  %1012 = vmatpush.bf16.msra.mxu1 %v1560_v24 }
  0x9b   :  { %vm113_vm15 = vmor %vm101_vm14, %vm109_vm11  ;;  %1000 = vmatpush.bf16.msra.mxu0 %v1551_v25 }
  0x9c   :  { %vm1765_vm1 = vmpackc.low %vm113_vm15, %vm113_vm15 }
  0x9d   :  { %1209 = vmatmul.msk.bf16.vlgmr.msra.gmra.mxu3 %vm1765_vm1, %v1705_v18 }
  0x9e   :  { %1037 = vmatpush.bf16.msra.mxu3 %v1577_v27  ;;  %1025 = vmatpush.bf16.msra.mxu2 %v1568_v28 }
  0x9f   :  { %1013 = vmatpush.bf16.msra.mxu1 %v1559_v29  ;;  %1001 = vmatpush.bf16.msra.mxu0 %v1550_v30 }
  0xa1   :  { %1339 = vmatmul.msk.bf16.vlgmr.msrb.gmra.mxu0 %vm1744_vm8, %v1705_v18 }
  0xa2   :  { %1038 = vmatpush.bf16.msra.mxu3 %v1576_v32  ;;  %1026 = vmatpush.bf16.msra.mxu2 %v1567_v33 }
  0xa3   :  { %1014 = vmatpush.bf16.msra.mxu1 %v1558_v34  ;;  %1002 = vmatpush.bf16.msra.mxu0 %v1549_v35 }
  0xa5   :  { %1341 = vmatmul.msk.bf16.vlgmr.msrb.gmra.mxu1 %vm1751_vm0, %v1705_v18 }
  0xa6   :  { %1039 = vmatpush.bf16.msra.mxu3 %v1575_v36  ;;  %1027 = vmatpush.bf16.msra.mxu2 %v1566_v37 }
  0xa7   :  { %1015 = vmatpush.bf16.msra.mxu1 %v1557_v38  ;;  %1003 = vmatpush.bf16.msra.mxu0 %v1548_v39 }
  0xa9   :  { %1343 = vmatmul.msk.bf16.vlgmr.msrb.gmra.mxu2 %vm1758_vm9, %v1705_v18 }
  0xaa   :  { %1040 = vmatpush.bf16.msra.mxu3 %v1574_v40  ;;  %1028 = vmatpush.bf16.msra.mxu2 %v1565_v41 }
  0xab   :  { %1016 = vmatpush.bf16.msra.mxu1 %v1556_v42  ;;  %1004 = vmatpush.bf16.msra.mxu0 %v1547_v43 }
  0xad   :  { %1345 = vmatmul.msk.bf16.vlgmr.msrb.gmra.mxu3 %vm1765_vm1, %v1705_v18 }
  0xae   :  { %1041 = vmatpush.bf16.msra.mxu3 %v1573_v44  ;;  %1029 = vmatpush.bf16.msra.mxu2 %v1564_v45 }
  0xaf   :  { %1017 = vmatpush.bf16.msra.mxu1 %v1555_v46  ;;  %1005 = vmatpush.bf16.msra.mxu0 %v1546_v47 }
  0xb2   :  { %1042 = vmatpush.bf16.msra.mxu3 %v1572_v48  ;;  %1030 = vmatpush.bf16.msra.mxu2 %v1563_v49 }
  0xb3   :  { %1018 = vmatpush.bf16.msra.mxu1 %v1554_v50  ;;  %1475 = vmatmul.msk.bf16.vlgmr.msra.gmra.mxu0 %vm1744_vm8, %v1705_v18 }
  0xb6   :  { %1043 = vmatpush.bf16.msra.mxu3 %v1571_v51  ;;  %1031 = vmatpush.bf16.msra.mxu2 %v1562_v52 }
  0xb7   :  { %1477 = vmatmul.msk.bf16.vlgmr.msra.gmra.mxu1 %vm1751_vm0, %v1705_v18 }
  0xb9   :  { %1479 = vmatmul.msk.bf16.vlgmr.msra.gmra.mxu2 %vm1758_vm9, %v1705_v18 }
  0xba   :  { %1044 = vmatpush.bf16.msra.mxu3 %v1570_v53 }
  0xbd   :  { %1481 = vmatmul.msk.bf16.vlgmr.msra.gmra.mxu3 %vm1765_vm1, %v1705_v18 }
 0x10e   :  { %v455_v54 = vpop.f32.mrf.mxu0 }
 0x112   :  { %v468_v55 = vpop.f32.mrf.mxu1 }
 0x113   :  { %v469_v3 = vadd.f32 %v468_v55, %v455_v54 }
 0x116   :  { %v457_v56 = vpop.f32.mrf.mxu0 }
 0x11a   :  { %v470_v57 = vpop.f32.mrf.mxu1 }
 0x11c   :  { %v481_v58 = vpop.f32.mrf.mxu2 }
 0x11d   :  { %v482_v6 = vadd.f32 %v481_v58, %v469_v3 }
 0x11e   :  { %v699_v59 = vpop.f32.mrf.mxu0 }
 0x120   :  { %v494_v60 = vpop.f32.mrf.mxu3 }
 0x121   :  { %v495_v9 = vadd.f32 %v494_v60, %v482_v6 }
 0x122   :  { %v712_v61 = vpop.f32.mrf.mxu1 }
 0x123   :  { %v700_v10 = vadd.f32 %v699_v59, %v495_v9 }
 0x124   :  { %v483_v62 = vpop.f32.mrf.mxu2 }
 0x125   :  { %v713_v13 = vadd.f32 %v712_v61, %v700_v10 }
 0x126   :  { %v701_v63 = vpop.f32.mrf.mxu0 }
 0x128   :  { %v496_v0 = vpop.f32.mrf.mxu3 }
 0x12a   :  { %v714_v1 = vpop.f32.mrf.mxu1 }
 0x12c   :  { %v725_v2 = vpop.f32.mrf.mxu2 }
 0x12d   :  { %v726_v17 = vadd.f32 %v725_v2, %v713_v13 }
 0x130   :  { %v738_v4 = vpop.f32.mrf.mxu3  ;;  %v1007_v5 = vpop.f32.mrf.mxu0 }
 0x131   :  { %v739_v20 = vadd.f32 %v738_v4, %v726_v17 }
 0x134   :  { %v727_v7 = vpop.f32.mrf.mxu2  ;;  %v1020_v8 = vpop.f32.mrf.mxu1 }
 0x135   :  { %v1021_v14 = vadd.f32 %v1020_v8, %v1007_v5 }
 0x138   :  { %v740_v11 = vpop.f32.mrf.mxu3  ;;  %v1009_v12 = vpop.f32.mrf.mxu0 }
 0x13c   :  { %v1033_v15 = vpop.f32.mrf.mxu2  ;;  %v1022_v16 = vpop.f32.mrf.mxu1 }
 0x13d   :  { %v1034_v18 = vadd.f32 %v1033_v15, %v1021_v14 }
 0x140   :  { %v1046_v19 = vpop.f32.mrf.mxu3 }
 0x141   :  { %v1047_v21 = vadd.f32 %v1046_v19, %v1034_v18 }
 0x143   :  { %v1050_v22 = vadd.f32 %v1047_v21, %v739_v20 }
 0x144   :  { %v1035_v23 = vpop.f32.mrf.mxu2 }
 0x145   :  { %1051 = vst [vmem:[#allocation8] sm:$0xff] %v1050_v22 }
 0x146   :  { %1062 = dma.vmem_to_hbm [thread:$0]  %s1058_s3, 128, %s1060_s8, [#allocation4]  }
 0x148   :  { %v1048_v24 = vpop.f32.mrf.mxu3 }
 0x149   :  { %1694 = dma.done.wait [#allocation4], 128  }
 0x14a   :  { %1695 = vsyncadd [#allocation4], 4294967168 }
 0x14b   :  { %1067 = vsyncpa [#allocation3], 1 }
 0x14c   :  { %1068 = vsyncpa [#allocation6], 1 }
 0x14d   :  { %1069 = vsyncpa [#allocation4], 1 }

</bundles_post_ra>
